<compile_context>
chip_gen: v5e
topology: v5e:2x2
jax: 0.10.0
libtpu: 0.0.40
codegen_flags: <defaults>
</compile_context>

<pallas_src>
import numpy as np
import jax
import jax.numpy as jnp
from jax.experimental import pallas as pl
from jax.experimental.pallas import tpu as pltpu


def _matmul_prelu_kernel(w_ref, b_ref, a_ref, s_ref, o_ref):
    """One lane tile: (TC, Kpad) @ (Kpad, T) + bias, then per-channel PReLU.

    w_ref: (TC, Kpad) VMEM  -- pre-clamped, zero-embedded, K-padded weights (resident)
    b_ref: (TC, 1)  VMEM    -- per-output-channel bias
    a_ref: (TC, 1)  VMEM    -- per-output-channel PReLU slope
    s_ref: (Kpad, T) VMEM   -- im2col slab tile (lane axis = flattened N*H*W)
    o_ref: (TC, T)  VMEM    -- lane-dense output tile
    """
    # Single 128-deep MXU contraction per tile (no 25-long per-tap accumulate chain).
    # Precision note: DEFAULT (1-pass bf16) is borderline for the 1e-3 check and
    # Precision.HIGH is not handled by the Mosaic dot_general lowering, so keep
    # HIGHEST -- with one dot per lane tile it sits under the slab DMA (HBM-bound).
    acc = jnp.dot(w_ref[...], s_ref[...],
                  preferred_element_type=jnp.float32,
                  precision=jax.lax.Precision.HIGHEST)
    acc = acc + b_ref[...]                              # bias (broadcast over lanes)
    acc = jnp.where(acc > 0.0, acc, a_ref[...] * acc)   # PReLU
    o_ref[...] = acc.astype(o_ref.dtype)


def ted_conv2d(x, params, kernels, *, lane_tile_cap=8192):
    """Forward pass of Ted_Conv2d.

    x: (N, Cin, H, W) f32.
    params: list of (weight (cout,Cin,kh,kw), bias (cout,), alpha (1,) or (cout,)) per branch.
    kernels: list of (kh, kw) per branch.
    """
    N, Cin, H, W = x.shape
    for (kh, kw) in kernels:
        # TODO(synk): even kernel sizes would need asymmetric reflect padding; the
        # module's default config (1x1/3x3/5x5) is odd-only.
        assert kh % 2 == 1 and kw % 2 == 1, "only odd kernel sizes supported"
    pads = [((kh - 1) // 2, (kw - 1) // 2) for (kh, kw) in kernels]
    pmax_h = max(p[0] for p in pads)
    pmax_w = max(p[1] for p in pads)
    KHmax, KWmax = 2 * pmax_h + 1, 2 * pmax_w + 1
    K = KHmax * KWmax * Cin
    LANE = 128
    Kpad = max(LANE, -(-K // LANE) * LANE)   # fill MXU depth / keep everything 128-aligned
    HW = H * W
    total = N * HW

    # --- Weights: clamp (ConstrainedConv2d) once, zero-embed into max window, pad K. ---
    # Column layout: (dx * KHmax + dy) * Cin + ci  (matches slab row order below).
    w_rows, b_rows, a_rows = [], [], []
    for (kh, kw), (ph, pw), (w, b, a) in zip(kernels, pads, params):
        cout = w.shape[0]
        offh, offw = pmax_h - ph, pmax_w - pw
        wpad = jnp.pad(w, ((0, 0), (0, 0),
                           (offh, KHmax - kh - offh),
                           (offw, KWmax - kw - offw)))          # (cout, Cin, KHmax, KWmax)
        w_rows.append(jnp.transpose(wpad, (0, 3, 2, 1)).reshape(cout, K))
        b_rows.append(b.reshape(cout, 1))
        if a.size == 1:   # nn.PReLU() default: single slope shared across the branch
            a_rows.append(jnp.broadcast_to(jnp.reshape(a, (1, 1)), (cout, 1)))
        else:
            a_rows.append(a.reshape(cout, 1))
    w_all = jnp.clip(jnp.concatenate(w_rows, axis=0).astype(jnp.float32), -1.0, 1.0)
    w_all = jnp.pad(w_all, ((0, 0), (0, Kpad - K)))              # (TC, Kpad)
    b_all = jnp.concatenate(b_rows, axis=0).astype(jnp.float32)  # (TC, 1)
    a_all = jnp.concatenate(a_rows, axis=0).astype(jnp.float32)  # (TC, 1)
    TC = int(w_all.shape[0])

    # --- im2col slab in the wrapper: reflect-pad ONCE with the max padding. ---
    if pmax_h or pmax_w:
        xp = jnp.pad(x, ((0, 0), (0, 0), (pmax_h, pmax_h), (pmax_w, pmax_w)),
                     mode="reflect")
    else:
        xp = x
    taps = []
    for dx in range(KWmax):
        for dy in range(KHmax):
            taps.append(xp[:, :, dy:dy + H, dx:dx + W])          # (N, Cin, H, W)
    slab = jnp.stack(taps, axis=1).reshape(N, K, HW)             # row = (dx*KHmax+dy)*Cin+ci
    slab = jnp.transpose(slab, (1, 0, 2)).reshape(K, total)      # (K, N*H*W)
    slab = slab.astype(jnp.float32)

    # --- Lane tiling: amortize ~0.35us/step, keep >=2 tiles for megacore, cap VMEM. ---
    total128 = -(-total // LANE) * LANE
    if total128 >= 2 * LANE:
        T = max(LANE, min(lane_tile_cap, (total128 // 2) // LANE * LANE))
    else:
        T = LANE
    num_tiles = -(-total128 // T)
    total_pad = num_tiles * T
    slab = jnp.pad(slab, ((0, Kpad - K), (0, total_pad - total)))  # (Kpad, total_pad)

    out_flat = pl.pallas_call(
        _matmul_prelu_kernel,
        out_shape=jax.ShapeDtypeStruct((TC, total_pad), x.dtype),
        grid=(num_tiles,),
        in_specs=[
            pl.BlockSpec((TC, Kpad), lambda t: (0, 0)),   # resident weights
            pl.BlockSpec((TC, 1), lambda t: (0, 0)),      # bias
            pl.BlockSpec((TC, 1), lambda t: (0, 0)),      # PReLU slopes
            pl.BlockSpec((Kpad, T), lambda t: (0, t)),    # slab lane tile
        ],
        out_specs=pl.BlockSpec((TC, T), lambda t: (0, t)),  # lane-dense output tile
        compiler_params=pltpu.CompilerParams(
            dimension_semantics=("parallel",)),
    )(w_all, b_all, a_all, slab)

    out = out_flat[:, :total].reshape(TC, N, H, W)
    return jnp.transpose(out, (1, 0, 2, 3))


def _reference(x, params, kernels):
    """Pure-JAX reference (lax.conv) for correctness checking."""
    outs = []
    for (kh, kw), (w, b, a) in zip(kernels, params):
        ph, pw = (kh - 1) // 2, (kw - 1) // 2
        xp = jnp.pad(x, ((0, 0), (0, 0), (ph, ph), (pw, pw)), mode="reflect") \
            if (ph or pw) else x
        wc = jnp.clip(w, -1.0, 1.0)
        y = jax.lax.conv_general_dilated(
            xp, wc, window_strides=(1, 1), padding="VALID",
            dimension_numbers=("NCHW", "OIHW", "NCHW"),
            precision=jax.lax.Precision.HIGHEST)
        y = y + b[None, :, None, None]
        y = jnp.where(y > 0.0, y, a[0] * y)
        outs.append(y)
    return jnp.concatenate(outs, axis=1)


if __name__ == "__main__":
    # Module config: Ted_Conv2d(in_channels=4, out_channels=[4, 4, 4])
    N, Cin, H, W = 2, 4, 16, 16
    kernels = [(1, 1), (3, 3), (5, 5)]
    out_channels = [4, 4, 4]

    key = jax.random.PRNGKey(0)
    kx, *kws = jax.random.split(key, 1 + 2 * len(kernels))

    x = jax.random.normal(kx, (N, Cin, H, W), dtype=jnp.float32)

    params = []
    for i, ((kh, kw), cout) in enumerate(zip(kernels, out_channels)):
        kw_key, kb_key = kws[2 * i], kws[2 * i + 1]
        fan_in = Cin * kh * kw
        bound = 1.0 / np.sqrt(fan_in)
        w = jax.random.uniform(kw_key, (cout, Cin, kh, kw),
                               minval=-bound, maxval=bound, dtype=jnp.float32)
        b = jax.random.uniform(kb_key, (cout,),
                               minval=-bound, maxval=bound, dtype=jnp.float32)
        a = jnp.full((1,), 0.25, dtype=jnp.float32)  # nn.PReLU() default
        params.append((w, b, a))

    out = ted_conv2d(x, params, kernels)
    out = jax.block_until_ready(out)

    expected_cout = sum(out_channels)
    assert out.shape == (N, expected_cout, H, W), out.shape

    ref = jax.block_until_ready(_reference(x, params, kernels))
    assert np.allclose(np.asarray(out), np.asarray(ref), rtol=1e-3, atol=1e-3), \
        "Pallas output mismatch vs JAX reference"

    print("KERNEL_OK")
</pallas_src>

<mosaic_0001>
module attributes {stable_mosaic.version = 11 : i64} {
  func.func @_matmul_prelu_kernel(%arg0: i32, %arg1: memref<12x128xf32, #tpu.memory_space<vmem>>, %arg2: memref<12x1xf32, #tpu.memory_space<vmem>>, %arg3: memref<12x1xf32, #tpu.memory_space<vmem>>, %arg4: memref<128x256xf32, #tpu.memory_space<vmem>>, %arg5: memref<12x256xf32, #tpu.memory_space<vmem>>) attributes {dimension_semantics = [#tpu.dimension_semantics<parallel>], iteration_bounds = array<i64: 2>, scalar_prefetch = 0 : i64, scratch_operands = 0 : i64, tpu.core_type = #tpu.core_type<tc>, window_params = [{pipeline_mode = #tpu.pipeline_mode<synchronous>, transform_indices = @transform_0, window_bounds = array<i64: 12, 128>}, {pipeline_mode = #tpu.pipeline_mode<synchronous>, transform_indices = @transform_1, window_bounds = array<i64: 12, 1>}, {pipeline_mode = #tpu.pipeline_mode<synchronous>, transform_indices = @transform_2, window_bounds = array<i64: 12, 1>}, {transform_indices = @transform_3, window_bounds = array<i64: 128, 256>}, {transform_indices = @transform_4, window_bounds = array<i64: 12, 256>}]} {
    %c0 = arith.constant 0 : index
    %c0_0 = arith.constant 0 : index
    %0 = vector.load %arg1[%c0, %c0_0] : memref<12x128xf32, #tpu.memory_space<vmem>>, vector<12x128xf32>
    %c0_1 = arith.constant 0 : index
    %c0_2 = arith.constant 0 : index
    %1 = vector.load %arg4[%c0_1, %c0_2] : memref<128x256xf32, #tpu.memory_space<vmem>>, vector<128x256xf32>
    %cst = arith.constant dense<0.000000e+00> : vector<12x256xf32>
    %2 = tpu.matmul %0, %1, %cst {dimension_numbers = #tpu.dot_dimension_numbers<[1], [0], [0], [1], [0, 0, 1, 1], [], []>, precision = #tpu.contract_precision<fp32>} : vector<12x128xf32>, vector<128x256xf32>, vector<12x256xf32> -> vector<12x256xf32>
    %c0_3 = arith.constant 0 : index
    %c0_4 = arith.constant 0 : index
    %3 = vector.load %arg2[%c0_3, %c0_4] : memref<12x1xf32, #tpu.memory_space<vmem>>, vector<12x1xf32>
    %4 = vector.broadcast %3 : vector<12x1xf32> to vector<12x256xf32>
    %5 = arith.addf %2, %4 : vector<12x256xf32>
    %cst_5 = arith.constant 0.000000e+00 : f32
    %6 = vector.broadcast %cst_5 : f32 to vector<12x256xf32>
    %7 = arith.cmpf ogt, %5, %6 : vector<12x256xf32>
    %c0_6 = arith.constant 0 : index
    %c0_7 = arith.constant 0 : index
    %8 = vector.load %arg3[%c0_6, %c0_7] : memref<12x1xf32, #tpu.memory_space<vmem>>, vector<12x1xf32>
    %9 = vector.broadcast %8 : vector<12x1xf32> to vector<12x256xf32>
    %10 = arith.mulf %9, %5 : vector<12x256xf32>
    %11 = arith.select %7, %5, %10 : vector<12x256xi1>, vector<12x256xf32>
    %c0_8 = arith.constant 0 : index
    %c0_9 = arith.constant 0 : index
    %12 = vector.load %arg5[%c0_8, %c0_9] : memref<12x256xf32, #tpu.memory_space<vmem>>, vector<12x256xf32>
    tpu.vector_store %arg5[%c0_8, %c0_9], %11 {strides = array<i32>} : memref<12x256xf32, #tpu.memory_space<vmem>>, vector<12x256xf32>,
    return
  }
  func.func @transform_0(%arg0: i32) -> (i32, i32) {
    %c0_i32 = arith.constant 0 : i32
    %c0_i32_0 = arith.constant 0 : i32
    %c0_i32_1 = arith.constant 0 : i32
    return %c0_i32, %c0_i32_0 : i32, i32
  }
  func.func @transform_1(%arg0: i32) -> (i32, i32) {
    %c0_i32 = arith.constant 0 : i32
    %c0_i32_0 = arith.constant 0 : i32
    %c0_i32_1 = arith.constant 0 : i32
    return %c0_i32, %c0_i32_0 : i32, i32
  }
  func.func @transform_2(%arg0: i32) -> (i32, i32) {
    %c0_i32 = arith.constant 0 : i32
    %c0_i32_0 = arith.constant 0 : i32
    %c0_i32_1 = arith.constant 0 : i32
    return %c0_i32, %c0_i32_0 : i32, i32
  }
  func.func @transform_3(%arg0: i32) -> (i32, i32) {
    %c0_i32 = arith.constant 0 : i32
    %c0_i32_0 = arith.constant 0 : i32
    return %c0_i32, %arg0 : i32, i32
  }
  func.func @transform_4(%arg0: i32) -> (i32, i32) {
    %c0_i32 = arith.constant 0 : i32
    %c0_i32_0 = arith.constant 0 : i32
    return %c0_i32, %arg0 : i32, i32
  }
}

</mosaic_0001>

<bundles_post_ra>
// kernel: tpu_custom_call.1
= control target key start
LH: loop header
LB: loop body
LE: loop exit
PB: predicated region body
PF: predicated region fallthrough
CT: control target
= control target key end

     0   :  { %9 = vsyncpa [#allocation3], 0  ;;  %s2041_s0 = inlined_call_operand.vmem [shape: f32[12,128], index: 0, kind: input, shape index: {}]   ;;  %s2042_s1 = inlined_call_operand.vmem [shape: f32[12,1], index: 1, kind: input, shape index: {}]   ;;  %s2043_s2 = inlined_call_operand.vmem [shape: f32[12,1], index: 2, kind: input, shape index: {}]   ;;  %s2044_s3 = inlined_call_operand.hbm [shape: f32[128,512], index: 3, kind: input, shape index: {}]   ;;  %s2045_s4 = inlined_call_operand.hbm [shape: f32[12,512], index: 4, kind: output, shape index: {}]  }
   0x1   :  { %11 = vsyncpa [#allocation3 + $0x1], 0 }
   0x2   :  { %12 = vsyncpa [#allocation4], 0 }
   0x3   :  { %14 = vsyncpa [#allocation4 + $0x1], 0  ;;  %s1328_s15 = smov 0   ;;  %s1330_s16 = smov 0  }
   0x4   :  { %s1332_s17 = smov 0   ;;  %s1334_s18 = smov 0  }
   0x5 LB: > { %s1349_s19 = sadd.s32 4294967295, %s1294_s18   ;;  %s1127_s20 = sadd.s32 4294967294, %s1294_s18   ;;  %s1294_s18 = sphi %s1334_s18, %s2111_s18   ;;  %s1290_s17 = sphi %s1332_s17, %s2110_s17   ;;  %s1286_s16 = sphi %s1330_s16, %s2109_s16   ;;  %s1282_s15 = sphi %s1328_s15, %s2108_s15  }
   0x6   : > { %s1353_s21 = sadd.s32 1, %s1294_s18   ;;  %s90_s22 = sadd.s32 1, %s1290_s17 }
   0x7   : > { %s87_s23 = ssub.s32 %s1294_s18, %s1353_s21  ;;  %p97_p0 = scmp.ne.s32.totalorder %s1290_s17, %s1286_s16 }
   0x8   : > { %p88_p1 = scmp.eq.s32.totalorder %s87_s23, 0  ;;  %p98_p2 = scmp.eq.s32.totalorder %s1294_s18, 0 }
   0x9   : > { %p103_p3 = scmp.ne.s32.totalorder %s1286_s16, %s1282_s15  ;;  %p104_p4 = scmp.eq.s32.totalorder %s1349_s19, 0 }
   0xa   : > { %s1365_s24 = scalar_select %p88_p1, %s1290_s17, %s90_s22  }
   0xb   : > { %p1367_p5 = por %p98_p2, %p97_p0  ;;  %p1371_p6 = por %p104_p4, %p103_p3 }
   0xc   : > { %p127_p7 = scmp.eq.s32.totalorder %s1349_s19, 1  ;;  %p133_p8 = scmp.eq.s32.totalorder %s1127_s20, 1 }
   0xd   : > { %p1129_p9 = scmp.ge.s32.totalorder %s1294_s18, 2  ;;  %p1155_p10 = scmp.lt.s32.totalorder %s1294_s18, 2 }
   0xe   : > { %p1378_p11 = por %p127_p7, %p97_p0  ;;  %p1382_p12 = por %p133_p8, %p103_p3 }
   0xf   : > { %s162_s29 = sand.u32 1, %s1290_s17   ;;  %s1141_s30 = sshll.u32 %s1294_s18, 4 }
  0x10   : > { %s1130_s5 = sshll.u32 %s162_s29, 8  ;;  %s171_s8 = scalar_lea.hbm %s2044_s3, %s1141_s30 }
  0x11   : > { %s172_s9 = sshll.u32 %s171_s8, 4  ;;  %s166_s10 = scalar_lea.vmem [#allocation2], %s1130_s5  ;;  %s173_s9 = int_to_ptr.hbm [resolvable:$true] %s172_s9 }
  0x12   : > { %s174_s11 = sshll.u32 %s166_s10, 4  ;;  %p1393_p13 = pnand %p1155_p10, %p1367_p5  ;;  %s175_s11 = int_to_ptr.vmem [resolvable:$true] %s174_s11 }
  0x13   : > { %p1133_p0 = scmp.ge.s32.totalorder %s1294_s18, 1  ;;  %s163_s13 = scalar_lea.sflag [#allocation3], %s162_s29 }
  0x14   : > { %s1198_s14 = sshra.s32 %s173_s9, 4  ;;  %p1202_p2 = pneg %p1393_p13  ;;  %s1199_s14 = int_to_ptr.hbm [resolvable:$true] %s1198_s14 }
  0x15   : > { %s1200_s20 = scalar_lea.hbm %s1199_s14, 256  ;;  %s1205_s30 = scalar_lea.hbm %s2044_s3, 512 }
  0x16   : > { %p1201_p1 = scmp.ne.s32.totalorder %s1199_s14, %s1200_s20  ;;  %p1206_p5 = scmp.lt.s32.totalorder %s1199_s14, %s2044_s3 }
  0x17   : > { %p1207_p7 = scmp.lt.s32.totalorder %s1205_s30, %s1200_s20 }
  0x18   : > { %p1203_p3 = pnand %p1202_p2, %p1201_p1 }
  0x19   : > { %p1208_p8 = por %p1207_p7, %p1206_p5 }
  0x1a   : > { %p1204_p4 = pneg %p1203_p3 }
  0x1c   : > { %p1209_p10 = pnand %p1208_p8, %p1204_p4 }
  0x1e   : > { %1212 = shalt.err (!%p1209_p10)
}
  0x1f   : > { %s1296_s29 = smov 512   ;;  %s1297_s6 = smov 256  }
  0x20   : > { %s1298_s7 = smov 16   ;;  %p182_p1 = scmp.lt.s32.totalorder %s1294_s18, 3 }
  0x21   : > { %1150 = dma.hbm_to_vmem [thread:$0]  (!%p1393_p13), %s173_s9, 4096, %s175_s11, %s163_s13, %s1296_s29, %s1297_s6, %s1298_s7  }
  0x22   : > { %p183_p2 = pnand %p1133_p0, %p182_p1 }
  0x24   : > { %186 = sbr.rel (%p183_p2) target bundleno = 309 (0x135), region = 36 }
  0x29   : > { %s1412_s8 = sand.u32 1, %s1286_s16  }
  0x2a   : > { %s1134_s10 = sshll.u32 %s1412_s8, 8  ;;  %s189_s14 = scalar_lea.sflag [#allocation3], %s1412_s8 }
  0x2b   : > { %s1416_s20 = scalar_lea.vmem [#allocation2], %s1134_s10 }
  0x2c   : > { %1273 = dma.done.wait (%p1371_p6), %s189_s14, 4096  }
  0x2d   : > { %1275 = vsyncadd (%p1371_p6), %s189_s14, 4294963200  ;;  %v252_v0 = vld [vmem:[%s1416_s20 + $0xf0] sm:$0xff]  ;;  %v250_v1 = vld [vmem:[%s1416_s20 + $0xe0] sm:$0xff]  ;;  %s1135_s7 = sshll.u32 %s1412_s8, 5  ;;  %s1142_s14 = sshll.u32 %s1349_s19, 4 }
  0x2e   : > { %v248_v2 = vld [vmem:[%s1416_s20 + $0xd0] sm:$0xff]  ;;  %v1425_v3 = vand.u32 4294901760, %v252_v0  ;;  %v1427_v4 = vand.u32 4294901760, %v250_v1  ;;  %v246_v6 = vld [vmem:[%s1416_s20 + $0xc0] sm:$0xff]  ;;  %v253_v59 = vld [vmem:[%s1416_s20 + $0xf8] sm:$0xff]  ;;  %s2001_s10 = scalar_lea.vmem [#allocation5], %s1135_s7  ;;  %s1050_s9 = scalar_lea.hbm %s2045_s4, %s1142_s14 }
  0x2f   : > { %v1429_v5 = vand.u32 4294901760, %v248_v2  ;;  %v244_v7 = vld [vmem:[%s1416_s20 + $0xb0] sm:$0xff]  ;;  %v242_v8 = vld [vmem:[%s1416_s20 + $0xa0] sm:$0xff]  ;;  %v1434_v9 = vand.u32 4294901760, %v246_v6  ;;  %s1051_s11 = sshll.u32 %s2001_s10, 4  ;;  %s1053_s12 = sshll.u32 %s1050_s9, 4  ;;  %s1052_s11 = int_to_ptr.vmem [resolvable:$true] %s1051_s11  ;;  %s1054_s12 = int_to_ptr.hbm [resolvable:$true] %s1053_s12 }
  0x30   : > { %v1436_v10 = vand.u32 4294901760, %v244_v7  ;;  %v1438_v11 = vand.u32 4294901760, %v242_v8  ;;  %v240_v12 = vld [vmem:[%s1416_s20 + $0x90] sm:$0xff]  ;;  %v238_v13 = vld [vmem:[%s1416_s20 + $0x80] sm:$0xff]  ;;  %267 = vmatpush.msra.mxu0 %v1425_v3  ;;  %v1444_v14 = vsub.f32 %v252_v0, %v1425_v3  ;;  %v1447_v15 = vsub.f32 %v250_v1, %v1427_v4  ;;  %480 = vmatpush.msra.mxu3 %v1425_v3  ;;  %s1039_s19 = scalar_lea.sflag [#allocation4], %s1412_s8  ;;  %s1242_s13 = sshra.s32 %s1054_s12, 4  ;;  %s1243_s13 = int_to_ptr.hbm [resolvable:$true] %s1242_s13 }
  0x31   : > { %v1451_v16 = vsub.f32 %v248_v2, %v1429_v5  ;;  %v1453_v17 = vand.u32 4294901760, %v240_v12  ;;  %v236_v18 = vld [vmem:[%s1416_s20 + $0x70] sm:$0xff]  ;;  %v1457_v19 = vsub.f32 %v246_v6, %v1434_v9  ;;  %v1470_v25 = vand.u32 4294901760, %v238_v13  ;;  %v234_v26 = vld [vmem:[%s1416_s20 + $0x60] sm:$0xff]  ;;  %v251_v6 = vld [vmem:[%s1416_s20 + $0xe8] sm:$0xff]  ;;  %s1244_s22 = scalar_lea.hbm %s1243_s13, 32  ;;  %p1249_p3 = scmp.lt.s32.totalorder %s1243_s13, %s2045_s4 }
  0x32   : > { %v1460_v20 = vsub.f32 %v244_v7, %v1436_v10  ;;  %v1463_v21 = vsub.f32 %v242_v8, %v1438_v11  ;;  %269 = vmatpush.msra.mxu0 %v1427_v4  ;;  %422 = vmatpush.msra.mxu2 %v1444_v14  ;;  %v317_v22 = vand.u32 4294901760, %v1444_v14  ;;  %v2060_v23 = vand.u32 4294901760, %v1447_v15  ;;  %v232_v36 = vld [vmem:[%s1416_s20 + $0x50] sm:$0xff]  ;;  %v230_v42 = vld [vmem:[%s1416_s20 + $0x40] sm:$0xff]  ;;  %p1245_p6 = scmp.ne.s32.totalorder %s1243_s13, %s1244_s22  ;;  %s1248_s25 = scalar_lea.hbm %s2045_s4, 64 }
  0x33   : > { %v2059_v24 = vand.u32 4294901760, %v1451_v16  ;;  %482 = vmatpush.msra.mxu3 %v1427_v4  ;;  %v2058_v27 = vand.u32 4294901760, %v1457_v19  ;;  %v1475_v28 = vand.u32 4294901760, %v236_v18  ;;  %v1478_v29 = vsub.f32 %v240_v12, %v1453_v17  ;;  %v228_v48 = vld [vmem:[%s1416_s20 + $0x30] sm:$0xff]  ;;  %v226_v54 = vld [vmem:[%s1416_s20 + $0x20] sm:$0xff]  ;;  %p1250_p4 = scmp.lt.s32.totalorder %s1248_s25, %s1244_s22 }
  0x34   : > { %271 = vmatpush.msra.mxu0 %v1429_v5  ;;  %425 = vmatpush.msra.mxu2 %v1447_v15  ;;  %v318_v30 = vsub.f32 %v1444_v14, %v317_v22  ;;  %v324_v31 = vsub.f32 %v1447_v15, %v2060_v23  ;;  %v2055_v33 = vand.u32 4294901760, %v1460_v20  ;;  %v1493_v34 = vand.u32 4294901760, %v234_v26  ;;  %v224_v61 = vld [vmem:[%s1416_s20 + $0x10] sm:$0xff]  ;;  %v222_v2 = vld [vmem:[%s1416_s20] sm:$0xff]  ;;  %v235_v23 = vld [vmem:[%s1416_s20 + $0x68] sm:$0xff]  ;;  %p1246_p13 = pnand %p1245_p6, %p1378_p11 }
  0x35   : > { %v330_v32 = vsub.f32 %v1451_v16, %v2059_v24  ;;  %484 = vmatpush.msra.mxu3 %v1429_v5  ;;  %v2054_v35 = vand.u32 4294901760, %v1463_v21  ;;  %v336_v39 = vsub.f32 %v1457_v19, %v2058_v27  ;;  %v1503_v40 = vsub.f32 %v238_v13, %v1470_v25  ;;  %p1251_p5 = por %p1250_p4, %p1249_p3 }
  0x36   : > { %273 = vmatpush.msra.mxu0 %v1434_v9  ;;  %v319_v37 = vand.u32 4294901760, %v318_v30  ;;  %428 = vmatpush.msra.mxu2 %v1451_v16  ;;  %v325_v38 = vand.u32 4294901760, %v324_v31  ;;  %v1507_v41 = vsub.f32 %v236_v18, %v1475_v28  ;;  %v342_v44 = vsub.f32 %v1460_v20, %v2055_v33  ;;  %p1247_p0 = pneg %p1246_p13 }
  0x37   : > { %486 = vmatpush.msra.mxu3 %v1434_v9  ;;  %v331_v43 = vand.u32 4294901760, %v330_v32  ;;  %v1514_v45 = vand.u32 4294901760, %v232_v36  ;;  %v2052_v46 = vand.u32 4294901760, %v1478_v29  ;;  %v348_v47 = vsub.f32 %v1463_v21, %v2054_v35  ;;  %v249_v32 = vld [vmem:[%s1416_s20 + $0xd8] sm:$0xff] }
  0x38   : > { %275 = vmatpush.msra.mxu0 %v1436_v10  ;;  %320 = vmatpush.msra.mxu1 %v319_v37  ;;  %v337_v49 = vand.u32 4294901760, %v336_v39  ;;  %v1524_v50 = vand.u32 4294901760, %v230_v42  ;;  %v2051_v51 = vand.u32 4294901760, %v1503_v40  ;;  %v1528_v52 = vsub.f32 %v234_v26, %v1493_v34  ;;  %p1252_p7 = pnand %p1251_p5, %p1247_p0 }
  0x39   : > { %431 = vmatpush.msra.mxu2 %v1457_v19  ;;  %488 = vmatpush.msra.mxu3 %v1436_v10  ;;  %v2049_v53 = vand.u32 4294901760, %v1507_v41  ;;  %v343_v55 = vand.u32 4294901760, %v342_v44  ;;  %v354_v56 = vsub.f32 %v1478_v29, %v2052_v46  ;;  %v1538_v57 = vand.u32 4294901760, %v228_v48  ;;  %v247_v44 = vld [vmem:[%s1416_s20 + $0xc8] sm:$0xff] }
  0x3a   : > { %277 = vmatpush.msra.mxu0 %v1438_v11  ;;  %326 = vmatpush.msra.mxu1 %v325_v38  ;;  %v1541_v58 = vsub.f32 %v232_v36, %v1514_v45  ;;  %v349_v60 = vand.u32 4294901760, %v348_v47  ;;  %v360_v62 = vsub.f32 %v1503_v40, %v2051_v51  ;;  %v1551_v63 = vand.u32 4294901760, %v226_v54 }
  0x3b   : > { %434 = vmatpush.msra.mxu2 %v1460_v20  ;;  %490 = vmatpush.msra.mxu3 %v1438_v11  ;;  %v2048_v0 = vand.u32 4294901760, %v1528_v52  ;;  %v1555_v1 = vsub.f32 %v230_v42, %v1524_v50  ;;  %v366_v7 = vsub.f32 %v1507_v41, %v2049_v53  ;;  %v1564_v8 = vand.u32 4294901760, %v253_v59 }
  0x3c   : > { %279 = vmatpush.msra.mxu0 %v1453_v17  ;;  %332 = vmatpush.msra.mxu1 %v331_v43  ;;  %v355_v12 = vand.u32 4294901760, %v354_v56  ;;  %v1567_v13 = vand.u32 4294901760, %v224_v61  ;;  %v2047_v18 = vand.u32 4294901760, %v1541_v58  ;;  %v1571_v26 = vsub.f32 %v228_v48, %v1538_v57 }
  0x3d   : > { %437 = vmatpush.msra.mxu2 %v1463_v21  ;;  %492 = vmatpush.msra.mxu3 %v1453_v17  ;;  %v1575_v30 = vand.u32 4294901760, %v222_v2  ;;  %v1577_v31 = vand.u32 4294901760, %v251_v6  ;;  %v361_v36 = vand.u32 4294901760, %v360_v62  ;;  %v372_v37 = vsub.f32 %v1528_v52, %v2048_v0 }
  0x3e   : > { %281 = vmatpush.msra.mxu0 %v1470_v25  ;;  %338 = vmatpush.msra.mxu1 %v337_v49  ;;  %v2046_v38 = vand.u32 4294901760, %v1555_v1  ;;  %v1586_v39 = vsub.f32 %v226_v54, %v1551_v63  ;;  %v367_v42 = vand.u32 4294901760, %v366_v7  ;;  %v1591_v43 = vsub.f32 %v253_v59, %v1564_v8 }
  0x3f   : > { %440 = vmatpush.msra.mxu2 %v1478_v29  ;;  %494 = vmatpush.msra.mxu3 %v1470_v25  ;;  %2072 = vst [vmem:[#allocation8_spill] sm:$0xff] %v1575_v30  ;;  %v378_v47 = vsub.f32 %v1541_v58, %v2047_v18  ;;  %v2050_v48 = vand.u32 4294901760, %v1571_v26  ;;  %v1600_v49 = vsub.f32 %v224_v61, %v1567_v13  ;;  %v1602_v54 = vand.u32 4294901760, %v249_v32 }
  0x40   : > { %283 = vmatpush.msra.mxu0 %v1475_v28  ;;  %344 = vmatpush.msra.mxu1 %v343_v55  ;;  %v245_v55 = vld [vmem:[%s1416_s20 + $0xb8] sm:$0xff]  ;;  %v1608_v56 = vsub.f32 %v222_v2, %v1575_v30  ;;  %v1611_v59 = vsub.f32 %v251_v6, %v1577_v31  ;;  %v384_v61 = vsub.f32 %v1555_v1, %v2046_v38  ;;  %v2053_v62 = vand.u32 4294901760, %v1586_v39 }
  0x41   : > { %443 = vmatpush.msra.mxu2 %v1503_v40  ;;  %496 = vmatpush.msra.mxu3 %v1475_v28  ;;  %v1618_v7 = vand.u32 4294901760, %v247_v44  ;;  %v2056_v2 = vand.u32 4294901760, %v1591_v43  ;;  %v1623_v6 = vand.u32 4294901760, %v245_v55  ;;  %v2057_v38 = vand.u32 4294901760, %v1600_v49 }
  0x42   : > { %285 = vmatpush.msra.mxu0 %v1493_v34  ;;  %350 = vmatpush.msra.mxu1 %v349_v60  ;;  %v373_v60 = vand.u32 4294901760, %v372_v37  ;;  %v390_v37 = vsub.f32 %v1571_v26, %v2050_v48  ;;  %v1632_v18 = vsub.f32 %v249_v32, %v1602_v54  ;;  %v2061_v0 = vand.u32 4294901760, %v1608_v56 }
  0x43   : > { %446 = vmatpush.msra.mxu2 %v1507_v41  ;;  %498 = vmatpush.msra.mxu3 %v1493_v34  ;;  %v2062_v53 = vand.u32 4294901760, %v1611_v59  ;;  %v396_v48 = vsub.f32 %v1586_v39, %v2053_v62  ;;  %v1644_v32 = vsub.f32 %v247_v44, %v1618_v7  ;;  %v690_v46 = vsub.f32 %v1591_v43, %v2056_v2 }
  0x44   : > { %287 = vmatpush.msra.mxu0 %v1514_v45  ;;  %356 = vmatpush.msra.mxu1 %v355_v12  ;;  %v243_v12 = vld [vmem:[%s1416_s20 + $0xa8] sm:$0xff]  ;;  %v391_v44 = vand.u32 4294901760, %v390_v37  ;;  %v402_v62 = vsub.f32 %v1600_v49, %v2057_v38  ;;  %v237_v37 = vld [vmem:[%s1416_s20 + $0x78] sm:$0xff]  ;;  %v2074_v14 = vand.u32 4294901760, %v1447_v15 }
  0x45   : > { %449 = vmatpush.msra.mxu2 %v1528_v52  ;;  %500 = vmatpush.msra.mxu3 %v1514_v45  ;;  %v1646_v51 = vand.u32 4294901760, %v243_v12  ;;  %v397_v2 = vand.u32 4294901760, %v396_v48  ;;  %v2073_v48 = vand.u32 4294901760, %v1632_v18  ;;  %v1692_v38 = vand.u32 4294901760, %v237_v37 }
  0x46   : > { %289 = vmatpush.msra.mxu0 %v1524_v50  ;;  %362 = vmatpush.msra.mxu1 %v361_v36  ;;  %v379_v36 = vand.u32 4294901760, %v378_v47  ;;  %v385_v47 = vand.u32 4294901760, %v384_v61  ;;  %v239_v61 = vld [vmem:[%s1416_s20 + $0x88] sm:$0xff]  ;;  %v403_v35 = vand.u32 4294901760, %v402_v62  ;;  %v220_v62 = vld [vmem:[%s2041_s0] sm:$0xff] }
  0x47   : > { %452 = vmatpush.msra.mxu2 %v1541_v58  ;;  %502 = vmatpush.msra.mxu3 %v1524_v50  ;;  %v1676_v27 = vsub.f32 %v243_v12, %v1646_v51  ;;  %v1678_v24 = vand.u32 4294901760, %v239_v61  ;;  %v702_v12 = vsub.f32 %v1632_v18, %v2073_v48  ;;  %v1719_v15 = vsub.f32 %v237_v37, %v1692_v38 }
  0x48   : > { %291 = vmatpush.msra.mxu0 %v1538_v57  ;;  %368 = vmatpush.msra.mxu1 %v367_v42  ;;  %v241_v42 = vld [vmem:[%s1416_s20 + $0x98] sm:$0xff] }
  0x49   : > { %455 = vmatpush.msra.mxu2 %v1555_v1  ;;  %504 = vmatpush.msra.mxu3 %v1538_v57  ;;  %v1662_v33 = vand.u32 4294901760, %v241_v42 }
  0x4a   : > { %293 = vmatpush.msra.mxu0 %v1551_v63  ;;  %374 = vmatpush.msra.mxu1 %v373_v60  ;;  %v1654_v60 = vsub.f32 %v245_v55, %v1623_v6  ;;  %v408_v55 = vsub.f32 %v1608_v56, %v2061_v0  ;;  %v691_v0 = vand.u32 4294901760, %v690_v46  ;;  %v1697_v46 = vand.u32 4294901760, %v235_v23 }
  0x4b   : > { %458 = vmatpush.msra.mxu2 %v1571_v26  ;;  %506 = vmatpush.msra.mxu3 %v1551_v63 }
  0x4c   : > { %295 = vmatpush.msra.mxu0 %v1567_v13  ;;  %380 = vmatpush.msra.mxu1 %v379_v36  ;;  %v696_v36 = vsub.f32 %v1611_v59, %v2062_v53  ;;  %v2064_v53 = vand.u32 4294901760, %v1654_v60 }
  0x4d   : > { %461 = vmatpush.msra.mxu2 %v1586_v39  ;;  %508 = vmatpush.msra.mxu3 %v1567_v13 }
  0x4e   : > { %297 = vmatpush.msra.mxu0 %v1575_v30  ;;  %386 = vmatpush.msra.mxu1 %v385_v47  ;;  %v1690_v47 = vsub.f32 %v241_v42, %v1662_v33  ;;  %v409_v42 = vand.u32 4294901760, %v408_v55  ;;  %v703_v55 = vand.u32 4294901760, %v702_v12  ;;  %v2078_v12 = vand.u32 4294901760, %v1676_v27 }
  0x4f   : > { %464 = vmatpush.msra.mxu2 %v1600_v49  ;;  %510 = vmatpush.msra.mxu3 %v1575_v30  ;;  %v233_v30 = vld [vmem:[%s1416_s20 + $0x58] sm:$0xff] }
  0x50   : > { %527 = vmatpush.msrb.mxu0 %v317_v22  ;;  %392 = vmatpush.msra.mxu1 %v391_v44  ;;  %v697_v22 = vand.u32 4294901760, %v696_v36  ;;  %v2075_v44 = vand.u32 4294901760, %v1644_v32  ;;  %v2076_v36 = vand.u32 4294901760, %v1451_v16  ;;  %v2077_v16 = vand.u32 4294901760, %v1457_v19 }
  0x51   : > { %467 = vmatpush.msra.mxu2 %v1608_v56  ;;  %692 = vmatpush.msrb.mxu3 %v691_v0  ;;  %v1726_v0 = vsub.f32 %v235_v23, %v1697_v46  ;;  %v2079_v19 = vand.u32 4294901760, %v1460_v20  ;;  %v2081_v20 = vand.u32 4294901760, %v1463_v21  ;;  %v227_v21 = vld [vmem:[%s1416_s20 + $0x28] sm:$0xff] }
  0x52   : > { %531 = vmatpush.msrb.mxu0 %v2074_v14  ;;  %398 = vmatpush.msra.mxu1 %v397_v2  ;;  %v708_v48 = vsub.f32 %v1644_v32, %v2075_v44  ;;  %v1708_v14 = vsub.f32 %v239_v61, %v1678_v24  ;;  %v714_v2 = vsub.f32 %v1654_v60, %v2064_v53  ;;  %v1721_v61 = vand.u32 4294901760, %v220_v62 }
  0x53   : > { %639 = vmatpush.msrb.mxu2 %v1564_v8  ;;  %698 = vmatpush.msrb.mxu3 %v697_v22  ;;  %v720_v53 = vsub.f32 %v1676_v27, %v2078_v12  ;;  %v1734_v44 = vand.u32 4294901760, %v233_v30  ;;  %v229_v22 = vld [vmem:[%s1416_s20 + $0x38] sm:$0xff] }
  0x54   : > { %535 = vmatpush.msrb.mxu0 %v2076_v36  ;;  %404 = vmatpush.msra.mxu1 %v403_v35  ;;  %v231_v36 = vld [vmem:[%s1416_s20 + $0x48] sm:$0xff]  ;;  %v709_v35 = vand.u32 4294901760, %v708_v48  ;;  %v715_v23 = vand.u32 4294901760, %v714_v2  ;;  %v1746_v12 = vsub.f32 %v220_v62, %v1721_v61 }
  0x55   : > { %641 = vmatpush.msrb.mxu2 %v1577_v31  ;;  %704 = vmatpush.msrb.mxu3 %v703_v55  ;;  %v1748_v37 = vand.u32 4294901760, %v231_v36  ;;  %v721_v2 = vand.u32 4294901760, %v720_v53  ;;  %v2082_v55 = vand.u32 4294901760, %v1708_v14  ;;  %v1759_v62 = vsub.f32 %v233_v30, %v1734_v44 }
  0x56   : > { %539 = vmatpush.msrb.mxu0 %v2077_v16  ;;  %410 = vmatpush.msra.mxu1 %v409_v42  ;;  %v2080_v42 = vand.u32 4294901760, %v1690_v47  ;;  %v2065_v16 = vand.u32 4294901760, %v1719_v15 }
  0x57   : > { %643 = vmatpush.msrb.mxu2 %v1602_v54  ;;  %710 = vmatpush.msrb.mxu3 %v709_v35  ;;  %v1775_v35 = vand.u32 4294901760, %v1746_v12 }
  0x58   : > { %543 = vmatpush.msrb.mxu0 %v2079_v19  ;;  %598 = vmatpush.msrb.mxu1 %v1425_v3  ;;  %v726_v48 = vsub.f32 %v1690_v47, %v2080_v42  ;;  %v2066_v3 = vand.u32 4294901760, %v1726_v0  ;;  %v732_v19 = vsub.f32 %v1708_v14, %v2082_v55  ;;  %v1761_v42 = vand.u32 4294901760, %v229_v22  ;;  %v225_v55 = vld [vmem:[%s1416_s20 + $0x18] sm:$0xff] }
  0x59   : > { %645 = vmatpush.msrb.mxu2 %v1618_v7  ;;  %716 = vmatpush.msrb.mxu3 %v715_v23  ;;  %v738_v30 = vsub.f32 %v1719_v15, %v2065_v16  ;;  %v1804_v16 = vand.u32 4294901760, %v225_v55 }
  0x5a   : > { %547 = vmatpush.msrb.mxu0 %v2081_v20  ;;  %600 = vmatpush.msrb.mxu1 %v1427_v4  ;;  %v2083_v20 = vand.u32 4294901760, %v1478_v29  ;;  %v221_v4 = vld [vmem:[%s2041_s0 + $0x8] sm:$0xf]  ;;  %v727_v53 = vand.u32 4294901760, %v726_v48  ;;  %v1778_v29 = vsub.f32 %v231_v36, %v1748_v37  ;;  %v744_v23 = vsub.f32 %v1726_v0, %v2066_v3 }
  0x5b   : > { %647 = vmatpush.msrb.mxu2 %v1623_v6  ;;  %v1786_v48 = vand.u32 4294901760, %v227_v21  ;;  %722 = vmatpush.msrb.mxu3 %v721_v2  ;;  %v1792_v36 = vsub.f32 %v229_v22, %v1761_v42  ;;  %v739_v3 = vand.u32 4294901760, %v738_v30  ;;  %v301_v2 = vsub.f32 %v1746_v12, %v1775_v35 }
  0x5c   : > { %551 = vmatpush.msrb.mxu0 %v2083_v20  ;;  %602 = vmatpush.msrb.mxu1 %v1429_v5  ;;  %v2084_v5 = vand.u32 4294901760, %v1503_v40  ;;  %v733_v20 = vand.u32 4294901760, %v732_v19  ;;  %v1794_v40 = vand.u32 4294901760, %v221_v4  ;;  %v2086_v22 = vand.u32 4294901760, %v1528_v52 }
  0x5d   : > { %649 = vmatpush.msrb.mxu2 %v1646_v51  ;;  %728 = vmatpush.msrb.mxu3 %v727_v53  ;;  %v2087_v53 = vand.u32 4294901760, %v1759_v62 }
  0x5e   : > { %555 = vmatpush.msrb.mxu0 %v2084_v5  ;;  %604 = vmatpush.msrb.mxu1 %v1434_v9  ;;  %v2085_v9 = vand.u32 4294901760, %v1507_v41  ;;  %v223_v5 = vld [vmem:[%s1416_s20 + $0x8] sm:$0xff]  ;;  %v745_v41 = vand.u32 4294901760, %v744_v23  ;;  %v1818_v19 = vsub.f32 %v221_v4, %v1794_v40  ;;  %v2089_v23 = vand.u32 4294901760, %v1778_v29 }
  0x5f   : > { %651 = vmatpush.msrb.mxu2 %v1662_v33  ;;  %734 = vmatpush.msrb.mxu3 %v733_v20  ;;  %v750_v30 = vsub.f32 %v1759_v62, %v2087_v53  ;;  %v1820_v52 = vand.u32 4294901760, %v223_v5  ;;  %v2090_v4 = vand.u32 4294901760, %v1555_v1  ;;  %v2091_v1 = vand.u32 4294901760, %v1571_v26 }
  0x60   : > { %559 = vmatpush.msrb.mxu0 %v2085_v9  ;;  %606 = vmatpush.msrb.mxu1 %v1436_v10  ;;  %v1810_v10 = vsub.f32 %v227_v21, %v1786_v48  ;;  %v761_v9 = vand.u32 4294901760, %v1792_v36  ;;  %v1826_v21 = vand.u32 4294901760, %v301_v2  ;;  %v756_v20 = vsub.f32 %v1778_v29, %v2089_v23 }
  0x61   : > { %653 = vmatpush.msrb.mxu2 %v1678_v24  ;;  %740 = vmatpush.msrb.mxu3 %v739_v3  ;;  %v1843_v2 = vand.u32 4294901760, %v1818_v19  ;;  %v2092_v53 = vand.u32 4294901760, %v1586_v39  ;;  %v2094_v39 = vand.u32 4294901760, %v1608_v56 }
  0x62   : > { %563 = vmatpush.msrb.mxu0 %v2086_v22  ;;  %608 = vmatpush.msrb.mxu1 %v1438_v11  ;;  %v2088_v11 = vand.u32 4294901760, %v1541_v58  ;;  %v1832_v22 = vsub.f32 %v225_v55, %v1804_v16  ;;  %v767_v58 = vand.u32 4294901760, %v1810_v10  ;;  %v762_v3 = vsub.f32 %v1792_v36, %v761_v9 }
  0x63   : > { %655 = vmatpush.msrb.mxu2 %v1692_v38  ;;  %746 = vmatpush.msrb.mxu3 %v745_v41  ;;  %v1846_v55 = vsub.f32 %v223_v5, %v1820_v52  ;;  %v309_v26 = vsub.f32 %v1818_v19, %v1843_v2 }
  0x64   : > { %567 = vmatpush.msrb.mxu0 %v2088_v11  ;;  %610 = vmatpush.msrb.mxu1 %v1453_v17  ;;  %v751_v17 = vand.u32 4294901760, %v750_v30  ;;  %v773_v41 = vand.u32 4294901760, %v1832_v22  ;;  %v768_v5 = vsub.f32 %v1810_v10, %v767_v58  ;;  %v2093_v11 = vand.u32 4294901760, %v1600_v49 }
  0x65   : > { %657 = vmatpush.msrb.mxu2 %v1697_v46  ;;  %303 = vmatmul.f32.vlgmr.msra.gmra.mxu0 %v1826_v21  ;;  %v779_v30 = vand.u32 4294901760, %v1846_v55  ;;  %v1875_v49 = vand.u32 4294901760, %v309_v26 }
  0x66   : > { %571 = vmatpush.msrb.mxu0 %v2090_v4  ;;  %612 = vmatpush.msrb.mxu1 %v1470_v25  ;;  %v757_v25 = vand.u32 4294901760, %v756_v20  ;;  %v769_v23 = vand.u32 4294901760, %v768_v5  ;;  %v2096_v20 = vand.u32 4294901760, %v1611_v59 }
  0x67   : > { %659 = vmatpush.msrb.mxu2 %v1734_v44  ;;  %752 = vmatpush.msrb.mxu3 %v751_v17 }
  0x68   : > { %575 = vmatpush.msrb.mxu0 %v2091_v1  ;;  %614 = vmatpush.msrb.mxu1 %v1475_v28  ;;  %v763_v28 = vand.u32 4294901760, %v762_v3 }
  0x69   : > { %661 = vmatpush.msrb.mxu2 %v1748_v37  ;;  %412 = vmatmul.f32.vlgmr.msra.gmra.mxu1 %v1721_v61 }
  0x6a   : > { %579 = vmatpush.msrb.mxu0 %v2092_v53  ;;  %616 = vmatpush.msrb.mxu1 %v1493_v34  ;;  %v774_v34 = vsub.f32 %v1832_v22, %v773_v41 }
  0x6b   : > { %663 = vmatpush.msrb.mxu2 %v1761_v42  ;;  %758 = vmatpush.msrb.mxu3 %v757_v25 }
  0x6c   : > { %583 = vmatpush.msrb.mxu0 %v2093_v11  ;;  %618 = vmatpush.msrb.mxu1 %v1514_v45  ;;  %v780_v45 = vsub.f32 %v1846_v55, %v779_v30  ;;  %v775_v56 = vand.u32 4294901760, %v774_v34 }
  0x6d   : > { %665 = vmatpush.msrb.mxu2 %v1786_v48  ;;  %764 = vmatpush.msrb.mxu3 %v763_v28 }
  0x6e   : > { %587 = vmatpush.msrb.mxu0 %v2094_v39  ;;  %620 = vmatpush.msrb.mxu1 %v1524_v50  ;;  %v781_v50 = vand.u32 4294901760, %v780_v45 }
  0x6f   : > { %470 = vmatmul.f32.vlgmr.msra.gmra.mxu2 %v1746_v12  ;;  %770 = vmatpush.msrb.mxu3 %v769_v23 }
  0x70   : > { %794 = vmatpush.msra.mxu0 %v1591_v43  ;;  %622 = vmatpush.msrb.mxu1 %v1538_v57  ;;  %v2095_v57 = vand.u32 4294901760, %v1591_v43  ;;  %v2098_v43 = vand.u32 4294901760, %v1632_v18 }
  0x71   : > { %667 = vmatpush.msrb.mxu2 %v1804_v16  ;;  %311 = vmatmul.f32.gmra.mxu0 %v1875_v49 }
  0x72   : > { %797 = vmatpush.msra.mxu0 %v1611_v59  ;;  %514 = vmatmul.f32.vlgmr.msra.gmra.mxu3 %v1775_v35  ;;  %v2101_v59 = vand.u32 4294901760, %v1676_v27 }
  0x73   : > { %624 = vmatpush.msrb.mxu1 %v1551_v63  ;;  %669 = vmatpush.msrb.mxu2 %v1820_v52  ;;  %v2097_v63 = vld [vmem:[#allocation8_spill] sm:$0xff] }
  0x74   : > { %776 = vmatpush.msrb.mxu3 %v775_v56  ;;  %800 = vmatpush.msra.mxu0 %v1632_v18  ;;  %v2100_v18 = vand.u32 4294901760, %v1654_v60 }
  0x75   : > { %899 = vmatpush.msra.mxu2 %v2095_v57  ;;  %416 = vmatmul.f32.gmra.mxu1 %v1794_v40 }
  0x76   : > { %626 = vmatpush.msrb.mxu1 %v1567_v13  ;;  %782 = vmatpush.msrb.mxu3 %v781_v50  ;;  %v2099_v13 = vand.u32 4294901760, %v1644_v32 }
  0x77   : > { %803 = vmatpush.msra.mxu0 %v1644_v32  ;;  %903 = vmatpush.msra.mxu2 %v2096_v20  ;;  %v2106_v32 = vand.u32 4294901760, %v1759_v62 }
  0x78   : > { %970 = vmatpush.msra.mxu3 %v1564_v8  ;;  %628 = vmatpush.msrb.mxu1 %v2097_v63 }
  0x79   : > { %806 = vmatpush.msra.mxu0 %v1654_v60  ;;  %907 = vmatpush.msra.mxu2 %v2098_v43 }
  0x7a   : > { %852 = vmatpush.msra.mxu1 %v1564_v8  ;;  %972 = vmatpush.msra.mxu3 %v1577_v31  ;;  %v254_v8 = vld [vmem:[%s2042_s1] sm:$0xff] }
  0x7b   : > { %475 = vmatmul.f32.gmra.mxu2 %v1818_v19  ;;  %809 = vmatpush.msra.mxu0 %v1676_v27  ;;  %v255_v27 = vld [vmem:[%s2042_s1 + $0x8] sm:$0xf] }
  0x7c   : > { %854 = vmatpush.msra.mxu1 %v1577_v31  ;;  %911 = vmatpush.msra.mxu2 %v2099_v13  ;;  %v1299_v31 = vmov 0  }
  0x7d   : > { %974 = vmatpush.msra.mxu3 %v1602_v54  ;;  %589 = vmatmul.f32.vlgmr.msrb.gmra.mxu0 %v1721_v61 }
  0x7e   : > { %520 = vmatmul.f32.gmra.mxu3 %v1843_v2  ;;  %812 = vmatpush.msra.mxu0 %v1690_v47 }
  0x7f   : > { %856 = vmatpush.msra.mxu1 %v1602_v54  ;;  %915 = vmatpush.msra.mxu2 %v2100_v18  ;;  %v2102_v54 = vand.u32 4294901760, %v1690_v47 }
  0x80   : > { %976 = vmatpush.msra.mxu3 %v1618_v7  ;;  %1196 = vset.pattern.permute.xlu0 %v1299_v31 }
  0x81   : > { %630 = vmatmul.f32.vlgmr.msrb.gmra.mxu1 %v1721_v61  ;;  %258 = vperm.xlu0 %1196, %v254_v8  }
  0x82   : > { %815 = vmatpush.msra.mxu0 %v1708_v14  ;;  %858 = vmatpush.msra.mxu1 %v1618_v7  ;;  %v2103_v7 = vand.u32 4294901760, %v1708_v14 }
  0x83   : > { %919 = vmatpush.msra.mxu2 %v2101_v59  ;;  %978 = vmatpush.msra.mxu3 %v1623_v6 }
  0x84   : > { %818 = vmatpush.msra.mxu0 %v1719_v15  ;;  %860 = vmatpush.msra.mxu1 %v1623_v6  ;;  %v2104_v6 = vand.u32 4294901760, %v1719_v15 }
  0x85   : > { %923 = vmatpush.msra.mxu2 %v2102_v54  ;;  %980 = vmatpush.msra.mxu3 %v1646_v51 }
  0x86   : > { %821 = vmatpush.msra.mxu0 %v1726_v0  ;;  %862 = vmatpush.msra.mxu1 %v1646_v51  ;;  %v1014_v51 = vld [vmem:[%s2043_s2] sm:$0xff] }
  0x87   : > { %927 = vmatpush.msra.mxu2 %v2103_v7  ;;  %982 = vmatpush.msra.mxu3 %v1662_v33 }
  0x88   : > { %593 = vmatmul.f32.gmra.mxu0 %v1794_v40  ;;  %675 = vmatmul.f32.vlgmr.msrb.gmra.mxu2 %v1826_v21 }
  0x89   : > { %824 = vmatpush.msra.mxu0 %v1759_v62  ;;  %864 = vmatpush.msra.mxu1 %v1662_v33  ;;  %v2105_v33 = vand.u32 4294901760, %v1726_v0 }
  0x8a   : > { %931 = vmatpush.msra.mxu2 %v2104_v6  ;;  %984 = vmatpush.msra.mxu3 %v1678_v24 }
  0x8b   : > { %634 = vmatmul.f32.gmra.mxu1 %v1794_v40  ;;  %784 = vmatmul.f32.vlgmr.msrb.gmra.mxu3 %v1721_v61 }
  0x8c   : > { %263 = vperm.xlu0 %1196, %v255_v27   ;;  %827 = vmatpush.msra.mxu0 %v1778_v29 }
  0x8d   : > { %866 = vmatpush.msra.mxu1 %v1678_v24  ;;  %935 = vmatpush.msra.mxu2 %v2105_v33  ;;  %v2107_v24 = vand.u32 4294901760, %v1778_v29 }
  0x8e   : > { %986 = vmatpush.msra.mxu3 %v1692_v38  ;;  %830 = vmatpush.msra.mxu0 %v1792_v36 }
  0x8f   : > { %868 = vmatpush.msra.mxu1 %v1692_v38  ;;  %939 = vmatpush.msra.mxu2 %v2106_v32  ;;  %v1015_v38 = vld [vmem:[%s2043_s2 + $0x8] sm:$0xf] }
  0x90   : > { %988 = vmatpush.msra.mxu3 %v1697_v46  ;;  %1197 = vset.pattern.permute.xlu1 %v1299_v31 }
  0x91   : > { %1018 = vperm.xlu1 %1197, %v1014_v51   ;;  %833 = vmatpush.msra.mxu0 %v1810_v10 }
  0x92   : > { %870 = vmatpush.msra.mxu1 %v1697_v46  ;;  %943 = vmatpush.msra.mxu2 %v2107_v24 }
  0x93   : > { %990 = vmatpush.msra.mxu3 %v1734_v44  ;;  %683 = vmatmul.f32.gmra.mxu2 %v1875_v49 }
  0x94   : > { %836 = vmatpush.msra.mxu0 %v1832_v22  ;;  %872 = vmatpush.msra.mxu1 %v1734_v44 }
  0x95   : > { %947 = vmatpush.msra.mxu2 %v761_v9  ;;  %992 = vmatpush.msra.mxu3 %v1748_v37 }
  0x96   : > { %788 = vmatmul.f32.gmra.mxu3 %v1794_v40  ;;  %839 = vmatpush.msra.mxu0 %v1846_v55 }
  0x97   : > { %874 = vmatpush.msra.mxu1 %v1748_v37  ;;  %951 = vmatpush.msra.mxu2 %v767_v58 }
  0x98   : > { %994 = vmatpush.msra.mxu3 %v1761_v42  ;;  %842 = vmatmul.f32.vlgmr.msra.gmra.mxu0 %v1746_v12 }
  0x99   : > { %876 = vmatpush.msra.mxu1 %v1761_v42  ;;  %955 = vmatpush.msra.mxu2 %v773_v41 }
  0x9a   : > { %996 = vmatpush.msra.mxu3 %v1786_v48  ;;  %1023 = vperm.xlu1 %1197, %v1015_v38  }
  0x9b   : > { %878 = vmatpush.msra.mxu1 %v1786_v48  ;;  %959 = vmatpush.msra.mxu2 %v779_v30 }
  0x9c   : > { %998 = vmatpush.msra.mxu3 %v1804_v16  ;;  %961 = vmatmul.f32.vlgmr.msra.gmra.mxu2 %v1721_v61 }
  0x9d   : > { %880 = vmatpush.msra.mxu1 %v1804_v16 }
  0x9e   : > { %1000 = vmatpush.msra.mxu3 %v1820_v52 }
  0x9f   : > { %1002 = vmatmul.f32.vlgmr.msra.gmra.mxu3 %v1721_v61  ;;  %882 = vmatpush.msra.mxu1 %v1820_v52 }
  0xa0   : > { %847 = vmatmul.f32.gmra.mxu0 %v1818_v19  ;;  %886 = vmatmul.f32.vlgmr.msra.gmra.mxu1 %v1775_v35 }
  0xa4   : > { %965 = vmatmul.f32.gmra.mxu2 %v1794_v40 }
  0xa7   : > { %1006 = vmatmul.f32.gmra.mxu3 %v1794_v40 }
  0xa8   : > { %892 = vmatmul.f32.gmra.mxu1 %v1843_v2 }
  0xe2   : > { %v304_v60 = vpop.f32.mrf.mxu0 }
  0xe6   : > { %v413_v47 = vpop.f32.mrf.mxu1 }
  0xee   : > { %v312_v46 = vpop.f32.mrf.mxu0 }
  0xf2   : > { %v417_v44 = vpop.f32.mrf.mxu1  ;;  %v471_v61 = vpop.f32.mrf.mxu2 }
  0xf3   : > { %v259_v15 = vpop.permute.xlu0 %258 }
  0xf4   : > { %v305_v14 = vadd.f32 %v304_v60, %v259_v15 }
  0xf5   : > { %v515_v37 = vpop.f32.mrf.mxu3 }
  0xf6   : > { %v414_v0 = vadd.f32 %v413_v47, %v305_v14 }
  0xf8   : > { %v472_v16 = vadd.f32 %v471_v61, %v414_v0 }
  0xfa   : > { %v516_v12 = vadd.f32 %v515_v37, %v472_v16  ;;  %v590_v62 = vpop.f32.mrf.mxu0 }
  0xfc   : > { %v591_v42 = vadd.f32 %v590_v62, %v516_v12 }
  0xfe   : > { %v264_v35 = vpop.permute.xlu0 %263  ;;  %v631_v29 = vpop.f32.mrf.mxu1 }
  0xff   : > { %v313_v48 = vadd.f32 %v312_v46, %v264_v35  ;;  %v632_v36 = vadd.f32 %v631_v29, %v591_v42  ;;  %v476_v40 = vpop.f32.mrf.mxu2 }
 0x101   : > { %v418_v19 = vadd.f32 %v417_v44, %v313_v48  ;;  %v521_v10 = vpop.f32.mrf.mxu3  ;;  %vm1010_vm0 = vcmp.gt.f32.partialorder %v632_v36, 0.0 }
 0x103   : > { %v1019_v9 = vpop.permute.xlu1 %1018  ;;  %v477_v52 = vadd.f32 %v476_v40, %v418_v19 }
 0x104   : > { %v1026_v21 = vmul.f32 %v1019_v9, %v632_v36 }
 0x105   : > { %v522_v22 = vadd.f32 %v521_v10, %v477_v52  ;;  %v594_v4 = vpop.f32.mrf.mxu0 }
 0x106   : > { %v1030_v58 = vsel %vm1010_vm0, %v632_v36, %v1026_v21 }
 0x107   : > { %1034 = vst [vmem:[%s2001_s10] sm:$0xff] %v1030_v58  ;;  %v595_v17 = vadd.f32 %v594_v4, %v522_v22 }
 0x108   : > { %v635_v3 = vpop.f32.mrf.mxu1 }
 0x109   : > { %v636_v2 = vadd.f32 %v635_v3, %v595_v17 }
 0x10b   : > { %vm1012_vm1 = vcmp.gt.f32.partialorder %v636_v2, 0.0  ;;  %v676_v1 = vpop.f32.mrf.mxu2 }
 0x10c   : > { %v1024_v55 = vpop.permute.xlu1 %1023  ;;  %v677_v5 = vadd.f32 %v676_v1, %v259_v15 }
 0x10d   : > { %v1028_v25 = vmul.f32 %v1024_v55, %v636_v2 }
 0x10e   : > { %v785_v53 = vpop.f32.mrf.mxu3 }
 0x10f   : > { %v1032_v41 = vsel %vm1012_vm1, %v636_v2, %v1028_v25  ;;  %v786_v11 = vadd.f32 %v785_v53, %v677_v5 }
 0x110   : > { %1036 = vst [vmem:[%s2001_s10 + $0x10] sm:$0xf] %v1032_v41 }
 0x115   : > { %v843_v26 = vpop.f32.mrf.mxu0 }
 0x116   : > { %v684_v28 = vpop.f32.mrf.mxu2  ;;  %v844_v34 = vadd.f32 %v843_v26, %v786_v11 }
 0x117   : > { %v685_v23 = vadd.f32 %v684_v28, %v264_v35 }
 0x119   : > { %v789_v30 = vpop.f32.mrf.mxu3 }
 0x11a   : > { %v790_v57 = vadd.f32 %v789_v30, %v685_v23 }
 0x11d   : > { %v887_v39 = vpop.f32.mrf.mxu1  ;;  %v848_v50 = vpop.f32.mrf.mxu0 }
 0x11e   : > { %v888_v49 = vadd.f32 %v887_v39, %v844_v34  ;;  %v849_v43 = vadd.f32 %v848_v50, %v790_v57 }
 0x11f   : > { %v962_v45 = vpop.f32.mrf.mxu2 }
 0x120   : > { %v963_v56 = vadd.f32 %v962_v45, %v888_v49 }
 0x122   : > { %v1003_v20 = vpop.f32.mrf.mxu3 }
 0x123   : > { %v1004_v63 = vadd.f32 %v1003_v20, %v963_v56 }
 0x125   : > { %vm1011_vm2 = vcmp.gt.f32.partialorder %v1004_v63, 0.0  ;;  %v1027_v13 = vmul.f32 %v1019_v9, %v1004_v63  ;;  %v893_v8 = vpop.f32.mrf.mxu1 }
 0x126   : > { %v894_v18 = vadd.f32 %v893_v8, %v849_v43 }
 0x127   : > { %v1031_v31 = vsel %vm1011_vm2, %v1004_v63, %v1027_v13  ;;  %v966_v59 = vpop.f32.mrf.mxu2 }
 0x128   : > { %1035 = vst [vmem:[%s2001_s10 + $0x8] sm:$0xff] %v1031_v31  ;;  %v967_v54 = vadd.f32 %v966_v59, %v894_v18 }
 0x12a   : > { %v1007_v7 = vpop.f32.mrf.mxu3 }
 0x12b   : > { %v1008_v27 = vadd.f32 %v1007_v7, %v967_v54 }
 0x12d   : > { %vm1013_vm3 = vcmp.gt.f32.partialorder %v1008_v27, 0.0  ;;  %v1029_v6 = vmul.f32 %v1024_v55, %v1008_v27 }
 0x12f   : > { %v1033_v33 = vsel %vm1013_vm3, %v1008_v27, %v1029_v6 }
 0x130   : > { %1037 = vst [vmem:[%s2001_s10 + $0x18] sm:$0xf] %v1033_v33 }
 0x131   : > { %1255 = shalt.err (!%p1252_p7)
}
 0x132   : > { %s1300_s8 = smov 256   ;;  %s1301_s6 = smov 512  }
 0x133   : > { %s1302_s7 = smov 16  }
 0x134   : > { %1145 = dma.vmem_to_hbm [thread:$0]  (%p1378_p11), %s1052_s11, 512, %s1054_s12, %s1039_s19, %s1300_s8, %s1301_s6, %s1302_s7  }
 0x135 PF: > { %s1068_s10 = sand.u32 1, %s1282_s15   ;;  %p1152_p8 = pnand %p1129_p9, %p1382_p12 }
 0x136   : > { %s1069_s14 = scalar_lea.sflag [#allocation4], %s1068_s10 }
 0x137   : > { %p1153_p10 = pneg %p1152_p8 }
 0x139   : > { %1277 = dma.done.wait (%p1153_p10), %s1069_s14, 512  }
 0x13a   : > { %1279 = vsyncadd (%p1153_p10), %s1069_s14, 4294966784  ;;  %p17_p1 = scmp.ge.s32.totalorder %s1353_s21, 4   ;;  %s2108_s15 = smov %s1286_s16 }
 0x13b   : > { %s2109_s16 = smov %s1290_s17  ;;  %s2110_s17 = smov %s1365_s24 }
 0x13c   : > { %s2111_s18 = smov %s1353_s21  ;;  %19 = sbr.rel (!%p17_p1) target bundleno = 5 (0x5), region = 81 }
 0x141   :  { %1075 = vsyncpa [#allocation3], 1 }
 0x142   :  { %1077 = vsyncpa [#allocation3 + $0x1], 1 }
 0x143   :  { %1078 = vsyncpa [#allocation4], 1 }
 0x144   :  { %1080 = vsyncpa [#allocation4 + $0x1], 1 }

</bundles_post_ra>
